<compile_context>
chip_gen: v5e
topology: v5e:2x2
jax: 0.10.0
libtpu: 0.0.40
codegen_flags: <defaults>
</compile_context>

<pallas_src>
import functools
import math

import jax
import jax.numpy as jnp
from jax import lax
from jax.experimental import pallas as pl
from jax.experimental.pallas import tpu as pltpu


def _round_up(x, m):
    return pl.cdiv(x, m) * m


def _tpu_generation():
    try:
        kind = jax.devices()[0].device_kind.lower()
    except Exception:
        return None
    if "v5 lite" in kind or "v5e" in kind or "v5lite" in kind:
        return "v5e"
    if "v6" in kind:
        return "v6e"
    if "v7" in kind:
        return "v7x"
    return None


def _vmem_budget_bytes():
    """Scoped-VMEM budget: physical capacity minus ~18% headroom."""
    try:
        cap = int(pltpu.get_tpu_info().vmem_capacity_bytes)
    except Exception:
        cap = 128 << 20
    return int(cap * 0.82)


def _gelu(h, approximate):
    if approximate:
        # tanh approximation -> EUP slot; VALU stays free for the matmul path.
        return jax.nn.gelu(h, approximate=True)
    # exact erf GELU: bit parity with torch.nn.GELU() default.
    return 0.5 * h * (1.0 + lax.erf(h * jnp.asarray(0.7071067811865476, h.dtype)))


def _mlp_kernel_resident(x_ref, w1_ref, w2_ref, o_ref, *, approximate_gelu, act_dtype):
    # Fast path: full W1/W2 resident in VMEM -> matmul, GELU, matmul, no scratch.
    hid = jnp.dot(x_ref[...], w1_ref[...], preferred_element_type=jnp.float32)
    hid = _gelu(hid.astype(act_dtype), approximate_gelu)
    # TODO(synk): dropout omitted (inference mode); training-mode dropout would
    # need pltpu.prng_seed / prng_random_bits inside the kernel.
    o_ref[...] = jnp.dot(hid.astype(w2_ref.dtype), w2_ref[...],
                         preferred_element_type=jnp.float32).astype(o_ref.dtype)


def _mlp_kernel_stream(x_ref, w1_ref, w2_ref, o_ref, acc_ref, *,
                       approximate_gelu, act_dtype):
    # x_ref:  (tm, Dp)       token tile, resident across the hidden axis
    # w1_ref: (Dp, th)       hidden-dim chunk of W1
    # w2_ref: (th, Dp)       hidden-dim chunk of W2
    # acc_ref:(tm, Dp) f32   second-matmul accumulator
    h_idx = pl.program_id(1)

    @pl.when(h_idx == 0)
    def _init():
        acc_ref[...] = jnp.zeros_like(acc_ref)

    hid = jnp.dot(x_ref[...], w1_ref[...], preferred_element_type=jnp.float32)
    hid = _gelu(hid.astype(act_dtype), approximate_gelu)
    acc_ref[...] += jnp.dot(hid.astype(w2_ref.dtype), w2_ref[...],
                            preferred_element_type=jnp.float32)

    @pl.when(h_idx == pl.num_programs(1) - 1)
    def _finalize():
        o_ref[...] = acc_ref[...].astype(o_ref.dtype)


def prepare_mlp_weights(w1, w2, *, compute_dtype=None):
    """Pad feature dims to 128 multiples and (optionally) cast ONCE.

    Call at model-init time and pass the result to mlp_forward via `prepared=`
    so the weight padding/casting HBM traffic is hoisted out of every call.
    Weights use the x @ W layout: w1 (D, H), w2 (H, D) (torch Linear weight^T).
    Zero padding is exact: padded x cols hit zero W1 rows; padded hidden units
    are GELU(0)=0 against zero W2 rows; padded out cols are sliced off.
    """
    D, H = w1.shape
    assert w1.shape == (D, H) and w2.shape == (H, D)
    if compute_dtype is not None:
        w1 = w1.astype(compute_dtype)
        w2 = w2.astype(compute_dtype)
    Dp = _round_up(D, 128)
    Hp = _round_up(H, 128)
    if (Dp, Hp) != (D, H):
        w1 = jnp.pad(w1, ((0, Dp - D), (0, Hp - H)))
        w2 = jnp.pad(w2, ((0, Hp - H), (0, Dp - D)))
    return dict(w1=w1, w2=w2, D=D, H=H, Dp=Dp, Hp=Hp, compute_dtype=compute_dtype)


def _hidden_chunk(Hp, target):
    """Largest multiple of 128 that divides Hp and is <= target."""
    best, t = 128, 128
    while t <= min(Hp, target):
        if Hp % t == 0:
            best = t
        t += 128
    return best


def _choose_plan(M, Dp, Hp, isz, osz, gen, budget, tm_req, th_req):
    """Pick (fast_path, tm, th) that fits the VMEM budget."""
    if tm_req is not None:
        tm = tm_req
    else:
        # Token tile must clear the weight-streaming roofline (v6e's ridge is
        # the highest, ~680 FLOP/B -> bigger tile there).
        tm = {"v5e": 512, "v6e": 1024, "v7x": 512}.get(gen, 512)
    tm = max(8, min(tm, _round_up(M, 8)))
    if gen == "v7x" and M > 8:
        # Guarantee >=2 token tiles so the "parallel" axis shards across both TCs.
        tm = min(tm, max(8, _round_up((M + 1) // 2, 8)))

    while True:
        # Fast path: both full weight matrices resident, no hidden grid axis.
        fast_bytes = (2 * tm * Dp * isz + 2 * (Dp * Hp + Hp * Dp) * isz
                      + 2 * tm * Dp * osz + tm * Hp * 4)
        if th_req is None and fast_bytes <= budget:
            return True, tm, Hp
        # Streaming path: prefer fat hidden chunks to amortize the accumulator
        # read-modify-write and the ~0.35us per-grid-step overhead.
        targets = (th_req,) if th_req is not None else (2048, 1024, 512, 256, 128)
        for tgt in targets:
            th = _hidden_chunk(Hp, tgt)
            stream_bytes = (2 * tm * Dp * isz + 2 * (Dp * th + th * Dp) * isz
                            + 2 * tm * Dp * osz + tm * Dp * 4 + tm * th * 4)
            if stream_bytes <= budget:
                return False, tm, th
        if tm <= 8:
            return False, 8, _hidden_chunk(Hp, 128)
        tm = max(8, (tm // 16) * 8)


def mlp_forward(x, w1=None, w2=None, *, prepared=None, tm=None, th=None,
                compute_dtype=None, approximate_gelu=None):
    """Fused MLP forward: GELU(x @ W1) @ W2 (channels-last, bias-free, eval mode).

    Fast path: call prepare_mlp_weights(w1, w2, compute_dtype=jnp.bfloat16) once
    and pass via `prepared=` -- bf16 operands double the effective MXU rate on
    v6e/v7x and halve weight DMA bytes.
    """
    if prepared is None:
        prepared = prepare_mlp_weights(w1, w2, compute_dtype=compute_dtype)
    w1p, w2p = prepared["w1"], prepared["w2"]
    D, H, Dp, Hp = prepared["D"], prepared["H"], prepared["Dp"], prepared["Hp"]
    cdt = prepared["compute_dtype"]

    lead = x.shape[:-1]
    assert x.shape[-1] == D
    M = int(math.prod(lead))
    out_dtype = x.dtype

    if cdt is not None:
        x = x.astype(cdt)
    x2d = x.reshape(M, D)

    gen = _tpu_generation()
    budget = _vmem_budget_bytes()
    isz = jnp.dtype(x2d.dtype).itemsize
    osz = jnp.dtype(out_dtype).itemsize

    fast, tm_, th_ = _choose_plan(M, Dp, Hp, isz, osz, gen, budget, tm, th)

    Mp = _round_up(M, tm_)
    if (Mp, Dp) != (M, D):
        x2d = jnp.pad(x2d, ((0, Mp - M), (0, Dp - D)))

    # GELU flavor: exact erf (torch parity) for full-precision operands; tanh
    # (EUP slot, keeps the VALU free) for the bf16 fast path where the ~1e-3
    # deviation is below bf16 noise.
    low_precision = jnp.dtype(x2d.dtype).itemsize < 4
    if approximate_gelu is None:
        approximate_gelu = bool(low_precision)
    # bf16 activations on chips with a bf16 VPU/EUP (v6e/v7x); f32 on v5e.
    act_dtype = x2d.dtype if (low_precision and gen != "v5e") else jnp.float32

    n_tok_tiles = Mp // tm_
    weight_passes = 1 if fast else n_tok_tiles    # weights re-streamed per token tile
    cost = pl.CostEstimate(
        flops=4 * Mp * Dp * Hp,
        transcendentals=Mp * Hp,
        bytes_accessed=int(Mp * Dp * isz
                           + weight_passes * (Dp * Hp + Hp * Dp) * isz
                           + Mp * Dp * osz),
    )
    compiler_params = pltpu.CompilerParams(
        dimension_semantics=("parallel",) if fast else ("parallel", "arbitrary"),
        vmem_limit_bytes=int(budget),
    )

    if fast:
        kernel = functools.partial(_mlp_kernel_resident,
                                   approximate_gelu=approximate_gelu,
                                   act_dtype=act_dtype)
        grid_spec = pltpu.PrefetchScalarGridSpec(
            num_scalar_prefetch=0,
            grid=(n_tok_tiles,),
            in_specs=[
                pl.BlockSpec((tm_, Dp), lambda i: (i, 0)),   # x token tile
                pl.BlockSpec((Dp, Hp), lambda i: (0, 0)),    # full W1 (DMA'd once)
                pl.BlockSpec((Hp, Dp), lambda i: (0, 0)),    # full W2 (DMA'd once)
            ],
            out_specs=pl.BlockSpec((tm_, Dp), lambda i: (i, 0)),
        )
    else:
        kernel = functools.partial(_mlp_kernel_stream,
                                   approximate_gelu=approximate_gelu,
                                   act_dtype=act_dtype)
        grid_spec = pltpu.PrefetchScalarGridSpec(
            num_scalar_prefetch=0,
            grid=(n_tok_tiles, Hp // th_),
            in_specs=[
                pl.BlockSpec((tm_, Dp), lambda i, h: (i, 0)),  # x tile (resident over h)
                pl.BlockSpec((Dp, th_), lambda i, h: (0, h)),  # W1 hidden chunk
                pl.BlockSpec((th_, Dp), lambda i, h: (h, 0)),  # W2 hidden chunk
            ],
            out_specs=pl.BlockSpec((tm_, Dp), lambda i, h: (i, 0)),
            scratch_shapes=[pltpu.VMEM((tm_, Dp), jnp.float32)],
        )

    out = pl.pallas_call(
        kernel,
        out_shape=jax.ShapeDtypeStruct((Mp, Dp), out_dtype),
        grid_spec=grid_spec,
        compiler_params=compiler_params,
        cost_estimate=cost,
    )(x2d, w1p, w2p)

    return out[:M, :D].reshape(*lead, D)


def _reference(x, w1, w2):
    h = jnp.dot(x, w1)
    h = 0.5 * h * (1.0 + lax.erf(h / jnp.sqrt(2.0)))
    return jnp.dot(h, w2)


if __name__ == "__main__":
    # Small shapes consistent with the module: dim=32, expansion=4 -> hidden=128.
    B, S, D = 2, 8, 32
    H = 4 * D

    key = jax.random.PRNGKey(0)
    kx, k1, k2 = jax.random.split(key, 3)
    x = jax.random.normal(kx, (B, S, D), dtype=jnp.float32)
    # bias=False in the module; weights stored as (in, out), i.e. the PyTorch
    # Linear weight transposed, so the kernel computes x @ W directly.
    w1 = jax.random.normal(k1, (D, H), dtype=jnp.float32) * (1.0 / jnp.sqrt(D))
    w2 = jax.random.normal(k2, (H, D), dtype=jnp.float32) * (1.0 / jnp.sqrt(H))

    y_ref = _reference(x, w1, w2)

    # Exact-precision path: f32 operands, exact erf GELU (torch.nn.GELU parity).
    prep_f32 = prepare_mlp_weights(w1, w2)            # hoisted: once per model
    y = mlp_forward(x, prepared=prep_f32)
    jax.block_until_ready(y)
    assert y.shape == (B, S, D)
    assert jnp.allclose(y, y_ref, atol=1e-4, rtol=1e-4), "f32 path mismatch vs reference"

    # bf16 fast path: operands padded/cast once, tanh GELU on the EUP,
    # bf16 activations on v6e/v7x.
    prep_bf16 = prepare_mlp_weights(w1, w2, compute_dtype=jnp.bfloat16)
    y_bf16 = mlp_forward(x, prepared=prep_bf16)
    jax.block_until_ready(y_bf16)
    assert jnp.allclose(y_bf16.astype(jnp.float32), y_ref, atol=2e-1, rtol=2e-1), \
        "bf16 path diverged beyond bf16 tolerance"

    print("KERNEL_OK")
</pallas_src>

<mosaic_0001>
module attributes {stable_mosaic.version = 11 : i64} {
  func.func @_mlp_kernel_resident(%arg0: i32, %arg1: memref<16x128xf32, #tpu.memory_space<vmem>>, %arg2: memref<128x128xf32, #tpu.memory_space<vmem>>, %arg3: memref<128x128xf32, #tpu.memory_space<vmem>>, %arg4: memref<16x128xf32, #tpu.memory_space<vmem>>) attributes {dimension_semantics = [#tpu.dimension_semantics<parallel>], iteration_bounds = array<i64: 1>, scalar_prefetch = 0 : i64, scratch_operands = 0 : i64, tpu.core_type = #tpu.core_type<tc>, window_params = [{transform_indices = @transform_0, window_bounds = array<i64: 16, 128>}, {pipeline_mode = #tpu.pipeline_mode<synchronous>, transform_indices = @transform_1, window_bounds = array<i64: 128, 128>}, {pipeline_mode = #tpu.pipeline_mode<synchronous>, transform_indices = @transform_2, window_bounds = array<i64: 128, 128>}, {transform_indices = @transform_3, window_bounds = array<i64: 16, 128>}]} {
    %c0 = arith.constant 0 : index
    %c0_0 = arith.constant 0 : index
    %0 = vector.load %arg1[%c0, %c0_0] : memref<16x128xf32, #tpu.memory_space<vmem>>, vector<16x128xf32>
    %c0_1 = arith.constant 0 : index
    %c0_2 = arith.constant 0 : index
    %1 = vector.load %arg2[%c0_1, %c0_2] : memref<128x128xf32, #tpu.memory_space<vmem>>, vector<128x128xf32>
    %cst = arith.constant dense<0.000000e+00> : vector<16x128xf32>
    %2 = tpu.matmul %0, %1, %cst {dimension_numbers = #tpu.dot_dimension_numbers<[1], [0], [0], [1], [0, 0, 1, 1], [], []>} : vector<16x128xf32>, vector<128x128xf32>, vector<16x128xf32> -> vector<16x128xf32>
    %cst_3 = arith.constant 5.000000e-01 : f32
    %3 = vector.broadcast %cst_3 : f32 to vector<16x128xf32>
    %4 = arith.mulf %3, %2 : vector<16x128xf32>
    %cst_4 = arith.constant 0.707106769 : f32
    %5 = vector.broadcast %cst_4 : f32 to vector<16x128xf32>
    %6 = arith.mulf %2, %5 : vector<16x128xf32>
    %7 = math.erf %6 : vector<16x128xf32>
    %cst_5 = arith.constant 1.000000e+00 : f32
    %8 = vector.broadcast %cst_5 : f32 to vector<16x128xf32>
    %9 = arith.addf %8, %7 : vector<16x128xf32>
    %10 = arith.mulf %4, %9 : vector<16x128xf32>
    %c0_6 = arith.constant 0 : index
    %c0_7 = arith.constant 0 : index
    %11 = vector.load %arg3[%c0_6, %c0_7] : memref<128x128xf32, #tpu.memory_space<vmem>>, vector<128x128xf32>
    %cst_8 = arith.constant dense<0.000000e+00> : vector<16x128xf32>
    %12 = tpu.matmul %10, %11, %cst_8 {dimension_numbers = #tpu.dot_dimension_numbers<[1], [0], [0], [1], [0, 0, 1, 1], [], []>} : vector<16x128xf32>, vector<128x128xf32>, vector<16x128xf32> -> vector<16x128xf32>
    %c0_9 = arith.constant 0 : index
    %c0_10 = arith.constant 0 : index
    %13 = vector.load %arg4[%c0_9, %c0_10] : memref<16x128xf32, #tpu.memory_space<vmem>>, vector<16x128xf32>
    tpu.vector_store %arg4[%c0_9, %c0_10], %12 {strides = array<i32>} : memref<16x128xf32, #tpu.memory_space<vmem>>, vector<16x128xf32>,
    return
  }
  func.func @transform_0(%arg0: i32) -> (i32, i32) {
    %c0_i32 = arith.constant 0 : i32
    %c0_i32_0 = arith.constant 0 : i32
    return %arg0, %c0_i32 : i32, i32
  }
  func.func @transform_1(%arg0: i32) -> (i32, i32) {
    %c0_i32 = arith.constant 0 : i32
    %c0_i32_0 = arith.constant 0 : i32
    %c0_i32_1 = arith.constant 0 : i32
    return %c0_i32, %c0_i32_0 : i32, i32
  }
  func.func @transform_2(%arg0: i32) -> (i32, i32) {
    %c0_i32 = arith.constant 0 : i32
    %c0_i32_0 = arith.constant 0 : i32
    %c0_i32_1 = arith.constant 0 : i32
    return %c0_i32, %c0_i32_0 : i32, i32
  }
  func.func @transform_3(%arg0: i32) -> (i32, i32) {
    %c0_i32 = arith.constant 0 : i32
    %c0_i32_0 = arith.constant 0 : i32
    return %arg0, %c0_i32 : i32, i32
  }
}

</mosaic_0001>

<bundles_post_ra>
// kernel: tpu_custom_call.1
= control target key start
LH: loop header
LB: loop body
LE: loop exit
PB: predicated region body
PF: predicated region fallthrough
CT: control target
= control target key end

     0   :  { %8 = vsyncpa [#allocation3], 0  ;;  %s478_s0 = inlined_call_operand.hbm [shape: f32[16,128], index: 0, kind: input, shape index: {}]   ;;  %s479_s1 = inlined_call_operand.hbm [shape: f32[128,128], index: 1, kind: input, shape index: {}]   ;;  %s480_s2 = inlined_call_operand.hbm [shape: f32[128,128], index: 2, kind: input, shape index: {}]   ;;  %s481_s3 = inlined_call_operand.hbm [shape: f32[16,128], index: 3, kind: output, shape index: {}]  }
   0x1   :  { %9 = vsyncpa [#allocation6], 0 }
   0x2   :  { %10 = vsyncpa [#allocation4], 0  ;;  %s28_s14 = sshll.u32 %s479_s1, 4  ;;  %s398_s15 = smov [#allocation5]   ;;  %s29_s14 = int_to_ptr.hbm [resolvable:$true] %s28_s14 }
   0x3   :  { %s30_s16 = sshll.u32 %s398_s15, 4  ;;  %s15_s19 = sshll.u32 %s478_s0, 4  ;;  %s31_s16 = int_to_ptr.vmem [resolvable:$true] %s30_s16  ;;  %s16_s19 = int_to_ptr.hbm [resolvable:$true] %s15_s19 }
   0x4   :  { %s399_s20 = smov 128   ;;  %s400_s21 = smov 8  }
   0x5   :  { %36 = dma.hbm_to_vmem [thread:$0]  %s29_s14, 2048, %s31_s16, [#allocation6], %s399_s20, %s399_s20, %s400_s21  }
   0x6   :  { %s401_s22 = smov [#allocation2]   ;;  %s41_s1 = sshll.u32 %s480_s2, 4  ;;  %s42_s1 = int_to_ptr.hbm [resolvable:$true] %s41_s1 }
   0x7   :  { %s17_s23 = sshll.u32 %s401_s22, 4  ;;  %s402_s0 = smov [#allocation7]   ;;  %s18_s23 = int_to_ptr.vmem [resolvable:$true] %s17_s23 }
   0x8   :  { %23 = dma.hbm_to_vmem [thread:$0]  %s16_s19, 256, %s18_s23, [#allocation3], %s399_s20, %s399_s20, %s400_s21  }
   0x9   :  { %s43_s26 = sshll.u32 %s402_s0, 4  ;;  %s44_s26 = int_to_ptr.vmem [resolvable:$true] %s43_s26 }
   0xa   :  { %49 = dma.hbm_to_vmem [thread:$0]  %s42_s1, 2048, %s44_s26, [#allocation6], %s399_s20, %s399_s20, %s400_s21  }
   0xb   :  { %392 = dma.done.wait [#allocation3], 256  }
   0xc   :  { %393 = vsyncadd [#allocation3], 4294967040 }
   0xd   :  { %394 = dma.done.wait [#allocation6], 4096  }
   0xe   :  { %395 = vsyncadd [#allocation6], 4294963200  ;;  %v79_v0 = vld [vmem:[#allocation5 + $0x78] sm:$0xff]  ;;  %v78_v1 = vld [vmem:[#allocation5 + $0x70] sm:$0xff]  ;;  %s403_s2 = smov [#allocation8]   ;;  %s238_s30 = sshll.u32 %s481_s3, 4  ;;  %s239_s30 = int_to_ptr.hbm [resolvable:$true] %s238_s30 }
   0xf   :  { %80 = vmatpush.msra.mxu0 %v79_v0  ;;  %254 = vmatpush.msra.mxu2 %v79_v0  ;;  %v77_v2 = vld [vmem:[#allocation5 + $0x68] sm:$0xff]  ;;  %v76_v3 = vld [vmem:[#allocation5 + $0x60] sm:$0xff]  ;;  %v75_v4 = vld [vmem:[#allocation5 + $0x58] sm:$0xff]  ;;  %s236_s27 = sshll.u32 %s403_s2, 4  ;;  %s237_s27 = int_to_ptr.vmem [resolvable:$true] %s236_s27 }
  0x10   :  { %v74_v5 = vld [vmem:[#allocation5 + $0x50] sm:$0xff]  ;;  %v73_v6 = vld [vmem:[#allocation5 + $0x48] sm:$0xff]  ;;  %v72_v7 = vld [vmem:[#allocation5 + $0x40] sm:$0xff] }
  0x11   :  { %81 = vmatpush.msra.mxu0 %v78_v1  ;;  %255 = vmatpush.msra.mxu2 %v78_v1  ;;  %v71_v8 = vld [vmem:[#allocation5 + $0x38] sm:$0xff]  ;;  %v70_v9 = vld [vmem:[#allocation5 + $0x30] sm:$0xff]  ;;  %v69_v10 = vld [vmem:[#allocation5 + $0x28] sm:$0xff] }
  0x12   :  { %v68_v11 = vld [vmem:[#allocation5 + $0x20] sm:$0xff]  ;;  %v67_v12 = vld [vmem:[#allocation5 + $0x18] sm:$0xff]  ;;  %v66_v13 = vld [vmem:[#allocation5 + $0x10] sm:$0xff] }
  0x13   :  { %82 = vmatpush.msra.mxu0 %v77_v2  ;;  %256 = vmatpush.msra.mxu2 %v77_v2  ;;  %v65_v14 = vld [vmem:[#allocation5 + $0x8] sm:$0xff]  ;;  %v64_v15 = vld [vmem:[#allocation5] sm:$0xff]  ;;  %v62_v16 = vld [vmem:[#allocation2] sm:$0xff] }
  0x14   :  { %v63_v17 = vld [vmem:[#allocation2 + $0x8] sm:$0xff]  ;;  %v205_v19 = vld [vmem:[#allocation7 + $0x70] sm:$0xff]  ;;  %v204_v20 = vld [vmem:[#allocation7 + $0x68] sm:$0xff] }
  0x15   :  { %83 = vmatpush.msra.mxu0 %v76_v3  ;;  %257 = vmatpush.msra.mxu2 %v76_v3  ;;  %v206_v18 = vld [vmem:[#allocation7 + $0x78] sm:$0xff]  ;;  %v203_v21 = vld [vmem:[#allocation7 + $0x60] sm:$0xff]  ;;  %v201_v23 = vld [vmem:[#allocation7 + $0x50] sm:$0xff] }
  0x16   :  { %207 = vmatpush.msra.mxu1 %v206_v18  ;;  %270 = vmatpush.msra.mxu3 %v206_v18  ;;  %v202_v22 = vld [vmem:[#allocation7 + $0x58] sm:$0xff]  ;;  %v200_v25 = vld [vmem:[#allocation7 + $0x48] sm:$0xff]  ;;  %v199_v27 = vld [vmem:[#allocation7 + $0x40] sm:$0xff] }
  0x17   :  { %84 = vmatpush.msra.mxu0 %v75_v4  ;;  %258 = vmatpush.msra.mxu2 %v75_v4  ;;  %v198_v28 = vld [vmem:[#allocation7 + $0x38] sm:$0xff]  ;;  %v197_v30 = vld [vmem:[#allocation7 + $0x30] sm:$0xff]  ;;  %v196_v33 = vld [vmem:[#allocation7 + $0x28] sm:$0xff] }
  0x18   :  { %208 = vmatpush.msra.mxu1 %v205_v19  ;;  %271 = vmatpush.msra.mxu3 %v205_v19  ;;  %v195_v36 = vld [vmem:[#allocation7 + $0x20] sm:$0xff]  ;;  %v194_v40 = vld [vmem:[#allocation7 + $0x18] sm:$0xff]  ;;  %v193_v44 = vld [vmem:[#allocation7 + $0x10] sm:$0xff] }
  0x19   :  { %85 = vmatpush.msra.mxu0 %v74_v5  ;;  %259 = vmatpush.msra.mxu2 %v74_v5  ;;  %v192_v49 = vld [vmem:[#allocation7 + $0x8] sm:$0xff]  ;;  %v191_v53 = vld [vmem:[#allocation7] sm:$0xff] }
  0x1a   :  { %209 = vmatpush.msra.mxu1 %v204_v20  ;;  %272 = vmatpush.msra.mxu3 %v204_v20 }
  0x1b   :  { %86 = vmatpush.msra.mxu0 %v73_v6  ;;  %260 = vmatpush.msra.mxu2 %v73_v6 }
  0x1c   :  { %210 = vmatpush.msra.mxu1 %v203_v21  ;;  %273 = vmatpush.msra.mxu3 %v203_v21 }
  0x1d   :  { %87 = vmatpush.msra.mxu0 %v72_v7  ;;  %261 = vmatpush.msra.mxu2 %v72_v7 }
  0x1e   :  { %211 = vmatpush.msra.mxu1 %v202_v22  ;;  %274 = vmatpush.msra.mxu3 %v202_v22 }
  0x1f   :  { %88 = vmatpush.msra.mxu0 %v71_v8  ;;  %262 = vmatpush.msra.mxu2 %v71_v8 }
  0x20   :  { %212 = vmatpush.msra.mxu1 %v201_v23  ;;  %275 = vmatpush.msra.mxu3 %v201_v23 }
  0x21   :  { %89 = vmatpush.msra.mxu0 %v70_v9  ;;  %263 = vmatpush.msra.mxu2 %v70_v9 }
  0x22   :  { %213 = vmatpush.msra.mxu1 %v200_v25  ;;  %276 = vmatpush.msra.mxu3 %v200_v25 }
  0x23   :  { %90 = vmatpush.msra.mxu0 %v69_v10  ;;  %264 = vmatpush.msra.mxu2 %v69_v10 }
  0x24   :  { %214 = vmatpush.msra.mxu1 %v199_v27  ;;  %277 = vmatpush.msra.mxu3 %v199_v27 }
  0x25   :  { %91 = vmatpush.msra.mxu0 %v68_v11  ;;  %265 = vmatpush.msra.mxu2 %v68_v11 }
  0x26   :  { %215 = vmatpush.msra.mxu1 %v198_v28  ;;  %278 = vmatpush.msra.mxu3 %v198_v28 }
  0x27   :  { %92 = vmatpush.msra.mxu0 %v67_v12  ;;  %266 = vmatpush.msra.mxu2 %v67_v12 }
  0x28   :  { %216 = vmatpush.msra.mxu1 %v197_v30  ;;  %279 = vmatpush.msra.mxu3 %v197_v30 }
  0x29   :  { %93 = vmatpush.msra.mxu0 %v66_v13  ;;  %267 = vmatpush.msra.mxu2 %v66_v13 }
  0x2a   :  { %217 = vmatpush.msra.mxu1 %v196_v33  ;;  %280 = vmatpush.msra.mxu3 %v196_v33 }
  0x2b   :  { %94 = vmatpush.msra.mxu0 %v65_v14  ;;  %268 = vmatpush.msra.mxu2 %v65_v14 }
  0x2c   :  { %218 = vmatpush.msra.mxu1 %v195_v36  ;;  %281 = vmatpush.msra.mxu3 %v195_v36 }
  0x2d   :  { %95 = vmatpush.msra.mxu0 %v64_v15  ;;  %269 = vmatpush.msra.mxu2 %v64_v15 }
  0x2e   :  { %96 = vmatmul.f32.vlgmr.msra.gmra.mxu0 %v62_v16  ;;  %99 = vmatmul.f32.vlgmr.msra.gmra.mxu2 %v63_v17 }
  0x2f   :  { %219 = vmatpush.msra.mxu1 %v194_v40  ;;  %282 = vmatpush.msra.mxu3 %v194_v40 }
  0x31   :  { %220 = vmatpush.msra.mxu1 %v193_v44  ;;  %283 = vmatpush.msra.mxu3 %v193_v44 }
  0x33   :  { %221 = vmatpush.msra.mxu1 %v192_v49  ;;  %284 = vmatpush.msra.mxu3 %v192_v49 }
  0x35   :  { %222 = vmatpush.msra.mxu1 %v191_v53  ;;  %285 = vmatpush.msra.mxu3 %v191_v53 }
  0xab   :  { %v442_v24 = vpop.f32.mrf.mxu0 }
  0xac   :  { %v445_v26 = vmul.f32 0.70710677, %v442_v24  ;;  %v103_v44 = vmul.f32 0.5, %v442_v24 }
  0xae   :  { %v107_v29 = vmul.f32 %v445_v26, %v445_v26 }
  0xb0   :  { %v449_v31 = vmin.f32 %v107_v29, 16.0 }
  0xb1   :  { %v451_v32 = vpop.f32.mrf.mxu2 }
  0xb2   :  { %v109_v34 = vmul.f32 2.1237322e-06, %v449_v31  ;;  %v455_v35 = vmul.f32 0.70710677, %v451_v32  ;;  %v120_v37 = vmul.f32 3.8918573e-05, %v449_v31 }
  0xb4   :  { %v110_v38 = vadd.f32 0.00028619796, %v109_v34  ;;  %v147_v39 = vmul.f32 %v455_v35, %v455_v35  ;;  %v121_v41 = vadd.f32 0.001143296, %v120_v37 }
  0xb6   :  { %v111_v42 = vmul.f32 %v110_v38, %v449_v31  ;;  %v148_v43 = vmin.f32 %v147_v39, 16.0  ;;  %v122_v45 = vmul.f32 %v121_v41, %v449_v31 }
  0xb8   :  { %v149_v46 = vmul.f32 2.1237322e-06, %v148_v43  ;;  %v160_v47 = vmul.f32 3.8918573e-05, %v148_v43  ;;  %v112_v48 = vadd.f32 0.0036580483, %v111_v42 }
  0xb9   :  { %v123_v50 = vadd.f32 0.014752088, %v122_v45 }
  0xba   :  { %v150_v51 = vadd.f32 0.00028619796, %v149_v46  ;;  %v161_v52 = vadd.f32 0.001143296, %v160_v47  ;;  %v113_v57 = vmul.f32 %v112_v48, %v449_v31 }
  0xbb   :  { %v124_v54 = vmul.f32 %v123_v50, %v449_v31  ;;  %v104_v50 = vmul.f32 0.5, %v451_v32 }
  0xbc   :  { %v151_v55 = vmul.f32 %v150_v51, %v148_v43  ;;  %v162_v56 = vmul.f32 %v161_v52, %v148_v43  ;;  %v114_v63 = vadd.f32 0.05243302, %v113_v57 }
  0xbd   :  { %v125_v58 = vadd.f32 0.112945676, %v124_v54 }
  0xbe   :  { %v152_v59 = vadd.f32 0.0036580483, %v151_v55  ;;  %v163_v60 = vadd.f32 0.014752088, %v162_v56  ;;  %v115_v5 = vmul.f32 %v114_v63, %v449_v31 }
  0xbf   :  { %v126_v61 = vmul.f32 %v125_v58, %v449_v31 }
  0xc0   :  { %v164_v62 = vmul.f32 %v163_v60, %v148_v43  ;;  %v153_v1 = vmul.f32 %v152_v59, %v148_v43  ;;  %v116_v10 = vadd.f32 0.18741608, %v115_v5 }
  0xc1   :  { %v127_v0 = vadd.f32 0.4994258, %v126_v61 }
  0xc2   :  { %v165_v2 = vadd.f32 0.112945676, %v164_v62  ;;  %v154_v7 = vadd.f32 0.05243302, %v153_v1  ;;  %v117_v14 = vmul.f32 %v116_v10, %v449_v31 }
  0xc3   :  { %v128_v3 = vmul.f32 %v127_v0, %v449_v31 }
  0xc4   :  { %v166_v4 = vmul.f32 %v165_v2, %v148_v43  ;;  %v155_v11 = vmul.f32 %v154_v7, %v148_v43  ;;  %v118_v18 = vadd.f32 1.1283791, %v117_v14 }
  0xc5   :  { %v129_v6 = vadd.f32 1.0, %v128_v3 }
  0xc6   :  { %v167_v8 = vadd.f32 0.4994258, %v166_v4  ;;  %v156_v15 = vadd.f32 0.18741608, %v155_v11  ;;  %v119_v28 = vmul.f32 %v118_v18, %v445_v26 }
  0xc7   :  { %292 = vrcp.f32 %v129_v6  ;;  %v141_v19 = vand.u32 2147483648, %v129_v6  ;;  %v139_v23 = vand.u32 2147483647, %v129_v6  ;;  %vm135_vm1 = vweird.f32 %v129_v6 }
  0xc8   :  { %v168_v9 = vmul.f32 %v167_v8, %v148_v43  ;;  %v157_v21 = vmul.f32 %v156_v15, %v148_v43 }
  0xc9   :  { %v142_v29 = vor.u32 1.1754944e-38, %v141_v19  ;;  %vm140_vm3 = vcmp.eq.f32.partialorder %v139_v23, 8.507059e+37 }
  0xca   :  { %v169_v12 = vadd.f32 1.0, %v168_v9  ;;  %v158_v33 = vadd.f32 1.1283791, %v157_v21 }
  0xcc   :  { %294 = vrcp.f32 %v169_v12  ;;  %v181_v34 = vand.u32 2147483648, %v169_v12  ;;  %v179_v38 = vand.u32 2147483647, %v169_v12  ;;  %vm175_vm5 = vweird.f32 %v169_v12 }
  0xcd   :  { %v293_v13 = vpop.eup %292  ;;  %v159_v43 = vmul.f32 %v158_v33, %v455_v35 }
  0xce   :  { %v131_v16 = vmul.f32 %v293_v13, %v129_v6  ;;  %vm136_vm0 = vweird.f32 %v293_v13  ;;  %v182_v42 = vor.u32 1.1754944e-38, %v181_v34  ;;  %vm180_vm7 = vcmp.eq.f32.partialorder %v179_v38, 8.507059e+37 }
  0xcf   :  { %vm137_vm2 = vmor %vm135_vm1, %vm136_vm0 }
  0xd0   :  { %v132_v17 = vsub.f32 1.0, %v131_v16 }
  0xd2   :  { %v295_v20 = vpop.eup %294  ;;  %v133_v22 = vmul.f32 %v293_v13, %v132_v17 }
  0xd3   :  { %v171_v25 = vmul.f32 %v295_v20, %v169_v12  ;;  %vm176_vm4 = vweird.f32 %v295_v20 }
  0xd4   :  { %v134_v27 = vadd.f32 %v293_v13, %v133_v22  ;;  %vm177_vm6 = vmor %vm175_vm5, %vm176_vm4 }
  0xd5   :  { %v172_v30 = vsub.f32 1.0, %v171_v25 }
  0xd6   :  { %v138_v31 = vsel %vm137_vm2, %v293_v13, %v134_v27 }
  0xd7   :  { %v143_v36 = vsel %vm140_vm3, %v142_v29, %v138_v31  ;;  %v173_v37 = vmul.f32 %v295_v20, %v172_v30 }
  0xd8   :  { %v144_v39 = vmul.f32 %v143_v36, %v119_v28 }
  0xd9   :  { %v174_v40 = vadd.f32 %v295_v20, %v173_v37 }
  0xda   :  { %v252_v41 = vclamps-f32 %v144_v39, 1.0 }
  0xdb   :  { %v178_v26 = vsel %vm177_vm6, %v295_v20, %v174_v40 }
  0xdc   :  { %v187_v45 = vadd.f32 1.0, %v252_v41  ;;  %v183_v46 = vsel %vm180_vm7, %v182_v42, %v178_v26 }
  0xdd   :  { %v184_v47 = vmul.f32 %v183_v46, %v159_v43 }
  0xde   :  { %v189_v48 = vmul.f32 %v187_v45, %v103_v44 }
  0xdf   :  { %v253_v49 = vclamps-f32 %v184_v47, 1.0 }
  0xe0   :  { %223 = vmatmul.f32.vlgmr.msra.gmra.mxu1 %v189_v48 }
  0xe1   :  { %v188_v51 = vadd.f32 1.0, %v253_v49 }
  0xe3   :  { %v190_v52 = vmul.f32 %v188_v51, %v104_v50 }
  0xe5   :  { %226 = vmatmul.f32.vlgmr.msra.gmra.mxu3 %v190_v52 }
 0x15d   :  { %v224_v53 = vpop.f32.mrf.mxu1 }
 0x15e   :  { %230 = vst [vmem:[#allocation8] sm:$0xff] %v224_v53 }
 0x168   :  { %v227_v24 = vpop.f32.mrf.mxu3 }
 0x169   :  { %231 = vst [vmem:[#allocation8 + $0x8] sm:$0xff] %v227_v24 }
 0x16a   :  { %244 = dma.vmem_to_hbm [thread:$0]  %s237_s27, 256, %s239_s30, [#allocation4], %s399_s20, %s399_s20, %s400_s21  }
 0x16b   :  { %396 = dma.done.wait [#allocation4], 256  }
 0x16c   :  { %397 = vsyncadd [#allocation4], 4294967040 }
 0x16d   :  { %249 = vsyncpa [#allocation3], 1 }
 0x16e   :  { %250 = vsyncpa [#allocation6], 1 }
 0x16f   :  { %251 = vsyncpa [#allocation4], 1 }

</bundles_post_ra>
